<compile_context>
chip_gen: v5e
topology: v5e:2x2
jax: 0.10.0
libtpu: 0.0.40
codegen_flags: <defaults>
</compile_context>

<pallas_src>
import functools
import math

import jax
import jax.numpy as jnp
from jax.experimental import pallas as pl
from jax.experimental.pallas import tpu as pltpu


def _round_up(x, m):
    return ((x + m - 1) // m) * m


def _downsample_kernel(x_ref, w_ref, b_ref, o_ref):
    """One (batch, row-tile) step of Conv2d(kernel=3, stride=2, padding=1).

    x_ref: (2*(TH+1), 2*(Wo+1), Ci)  parity-deinterleaved padded input tile:
             row index pe*(TH+1)+i  <->  padded row 2*(tile_row_start+i)+pe
             col index pw*(Wo+1)+j  <->  padded col 2*j+pw
    w_ref: (9, Ci, Co)  conv taps, (kh, kw) row-major, each (in_ch, out_ch)
    b_ref: (1, Co)      bias (f32)
    o_ref: (Co, TH*Wo)  output tile: channels on sublanes, flattened pixels
                        (row-major over the tile) on lanes.
    """
    thp1 = x_ref.shape[0] // 2
    wop1 = x_ref.shape[1] // 2
    th, wo = thp1 - 1, wop1 - 1
    ci = x_ref.shape[2]
    co = o_ref.shape[0]
    tm = th * wo

    acc = jnp.zeros((tm, co), dtype=jnp.float32)
    for kh in range(3):                       # static 3x3 tap loop (unrolled)
        pe, qh = kh % 2, kh // 2
        for kw in range(3):
            pw, qw = kw % 2, kw // 2
            tap = x_ref[pl.ds(pe * thp1 + qh, th),
                        pl.ds(pw * wop1 + qw, wo), :]          # (TH, Wo, Ci)
            tap = tap.reshape(tm, ci)                          # im2col rows
            acc = acc + jnp.dot(tap, w_ref[kh * 3 + kw],
                                preferred_element_type=jnp.float32)
    acc = acc + b_ref[...]                                     # f32 bias add
    o_ref[...] = acc.T.astype(o_ref.dtype)                     # (Co, TH*Wo)


def _choose_row_tile(Ho, Wo, Ci, Co, in_itemsize, out_itemsize, budget_bytes):
    """Largest output-row tile whose (double-buffered) blocks fit the budget."""
    def tile_bytes(th):
        inp = 2 * (th + 1) * 2 * (Wo + 1) * Ci * in_itemsize
        out = Co * th * Wo * out_itemsize
        acc = th * Wo * Co * 4
        return 2 * (inp + out) + acc

    if tile_bytes(Ho) <= budget_bytes:
        return Ho
    step = 128 // math.gcd(Wo, 128)     # keeps TH*Wo % 128 == 0 when tiled
    th = step
    while th + step < Ho and tile_bytes(th + step) <= budget_bytes:
        th += step
    return th


@functools.partial(jax.jit,
                   static_argnames=("row_tile", "compute_dtype",
                                    "vmem_budget_bytes"))
def downsample_pallas(x_nchw, weight, bias, *, row_tile=None,
                      compute_dtype=jnp.float32,
                      vmem_budget_bytes=10 * 1024 * 1024):
    """Conv2d(kernel=3, stride=2, padding=1) forward, NCHW in / NCHW out.

    x_nchw : (N, Cin, H, W) float32
    weight : (Cout, Cin, 3, 3) float32 (PyTorch layout)
    bias   : (Cout,) float32
    compute_dtype: jnp.float32 (exact, default) or jnp.bfloat16 (half the
                   input/weight DMA bytes, native MXU dtype; accumulation
                   and bias add stay in f32).
    """
    N, Cin, H, W = x_nchw.shape
    Cout = weight.shape[0]
    out_dtype = x_nchw.dtype
    Ho = (H + 2 - 3) // 2 + 1
    Wo = (W + 2 - 3) // 2 + 1

    Ci = _round_up(Cin, 8)                   # sublane/lane friendly channels
    Co = _round_up(Cout, 8)
    in_itemsize = jnp.dtype(compute_dtype).itemsize
    out_itemsize = jnp.dtype(out_dtype).itemsize

    # ---- output-row tile (grid axis 1) ----
    step = 128 // math.gcd(Wo, 128)
    if row_tile is None:
        th = _choose_row_tile(Ho, Wo, Ci, Co, in_itemsize, out_itemsize,
                              vmem_budget_bytes)
    else:
        th = int(row_tile)
    th = max(1, min(th, Ho))
    if th < Ho:
        th = _round_up(th, step)             # lane-dense, legal out block
    if th >= Ho:
        th = Ho
    nT = -(-Ho // th)

    Hop = nT * th                            # padded output rows
    THp1, Wop1 = th + 1, Wo + 1
    Rp = 2 * (Hop + 1)                       # padded input rows (>= H + 2)
    Cp = 2 * Wop1                            # padded input cols (>= W + 2)

    # ---- glue (plain JAX, ~one pass over the input; no im2col tensor) ----
    x = jnp.transpose(x_nchw, (0, 2, 3, 1)).astype(compute_dtype)   # NHWC
    xp = jnp.pad(x, ((0, 0), (1, Rp - 1 - H), (1, Cp - 1 - W), (0, Ci - Cin)))
    # parity deinterleave: [n, pe, i, pw, j, c] = xp[n, 2i+pe, 2j+pw, c]
    xq = xp.reshape(N, Hop + 1, 2, Wop1, 2, Ci)
    xq = jnp.transpose(xq, (0, 2, 1, 4, 3, 5))   # (N, 2, Hop+1, 2, Wo+1, Ci)
    if nT == 1:
        xb = xq.reshape(N, 1, 2 * THp1, 2 * Wop1, Ci)
    else:
        tiles = [xq[:, :, t * th: t * th + THp1] for t in range(nT)]
        xb = jnp.stack(tiles, axis=1).reshape(N, nT, 2 * THp1, 2 * Wop1, Ci)

    # weights: (Cout, Cin, 3, 3) -> (3, 3, Cin, Cout) -> (9, Ci, Co)
    w9 = jnp.transpose(weight, (2, 3, 1, 0)).reshape(9, Cin, Cout)
    w9 = jnp.pad(w9, ((0, 0), (0, Ci - Cin), (0, Co - Cout)))
    w9 = w9.astype(compute_dtype)
    b2 = jnp.pad(bias, (0, Co - Cout)).reshape(1, Co).astype(jnp.float32)

    TM = th * Wo
    Mp = Hop * Wo

    out = pl.pallas_call(
        _downsample_kernel,
        out_shape=jax.ShapeDtypeStruct((N, Co, Mp), out_dtype),
        grid_spec=pltpu.PrefetchScalarGridSpec(
            num_scalar_prefetch=0,
            grid=(N, nT),
            in_specs=[
                pl.BlockSpec(
                    (pl.Squeezed(), pl.Squeezed(), 2 * THp1, 2 * Wop1, Ci),
                    lambda n, t: (n, t, 0, 0, 0)),
                pl.BlockSpec((9, Ci, Co), lambda n, t: (0, 0, 0)),
                pl.BlockSpec((1, Co), lambda n, t: (0, 0)),
            ],
            out_specs=pl.BlockSpec((pl.Squeezed(), Co, TM),
                                   lambda n, t: (n, 0, t)),
        ),
        compiler_params=pltpu.CompilerParams(
            dimension_semantics=("parallel", "parallel"),
            vmem_limit_bytes=48 * 1024 * 1024),
    )(xb, w9, b2)

    # (N, Co, Hop*Wo) -> NCHW, slicing off channel / row padding (no transpose).
    out = out.reshape(N, Co, Hop, Wo)
    return out[:, :Cout, :Ho, :]


def init_downsample_params(key, in_channels, out_channels):
    """Deterministic init mirroring torch.nn.Conv2d defaults
    (kaiming_uniform with a=sqrt(5) => U(-1/sqrt(fan_in), 1/sqrt(fan_in)))."""
    kw_key, b_key = jax.random.split(key)
    fan_in = in_channels * 3 * 3
    bound = 1.0 / jnp.sqrt(jnp.float32(fan_in))
    weight = jax.random.uniform(
        kw_key, (out_channels, in_channels, 3, 3),
        minval=-bound, maxval=bound, dtype=jnp.float32)
    bias = jax.random.uniform(
        b_key, (out_channels,), minval=-bound, maxval=bound, dtype=jnp.float32)
    return weight, bias


def _conv_ref(x, weight, bias):
    cout = weight.shape[0]
    return jax.lax.conv_general_dilated(
        x, weight, window_strides=(2, 2), padding=((1, 1), (1, 1)),
        dimension_numbers=("NCHW", "OIHW", "NCHW")) + bias.reshape(1, cout, 1, 1)


if __name__ == "__main__":
    key = jax.random.PRNGKey(0)
    k_x1, k_p1, k_x2, k_p2 = jax.random.split(key, 4)

    # --- test 1: small shapes, f32 compute, single row tile ---
    N, Cin, H, W, Cout = 2, 4, 16, 16, 8
    x1 = jax.random.normal(k_x1, (N, Cin, H, W), dtype=jnp.float32)
    w1, b1 = init_downsample_params(k_p1, Cin, Cout)
    y1 = jax.block_until_ready(downsample_pallas(x1, w1, b1))
    r1 = _conv_ref(x1, w1, b1)
    assert y1.shape == (N, Cout, (H - 1) // 2 + 1, (W - 1) // 2 + 1)
    assert jnp.allclose(y1, r1, atol=5e-4, rtol=5e-4)

    # --- test 2: forces the row-tiled path (grid = (2, 2), TH*Wo = 128) ---
    N2, Cin2, H2, W2, Cout2 = 2, 8, 32, 32, 16
    x2 = jax.random.normal(k_x2, (N2, Cin2, H2, W2), dtype=jnp.float32)
    w2, b2 = init_downsample_params(k_p2, Cin2, Cout2)
    y2 = jax.block_until_ready(downsample_pallas(x2, w2, b2, row_tile=8))
    r2 = _conv_ref(x2, w2, b2)
    assert y2.shape == (N2, Cout2, H2 // 2, W2 // 2)
    assert jnp.allclose(y2, r2, atol=5e-4, rtol=5e-4)

    # --- test 3: bf16 compute path (v5e/v6e/v7x MXU dtype), f32 accumulation ---
    y3 = jax.block_until_ready(
        downsample_pallas(x1, w1, b1, compute_dtype=jnp.bfloat16))
    assert jnp.allclose(y3, r1, atol=5e-2, rtol=5e-2)

    print("KERNEL_OK")
</pallas_src>

<mosaic_0001>
module attributes {stable_mosaic.version = 11 : i64} {
  func.func @_downsample_kernel(%arg0: i32, %arg1: i32, %arg2: memref<1x1x18x18x8xf32, #tpu.memory_space<vmem>>, %arg3: memref<9x8x8xf32, #tpu.memory_space<vmem>>, %arg4: memref<1x8xf32, #tpu.memory_space<vmem>>, %arg5: memref<1x8x64xf32, #tpu.memory_space<vmem>>) attributes {dimension_semantics = [#tpu.dimension_semantics<parallel>, #tpu.dimension_semantics<parallel>], iteration_bounds = array<i64: 2, 1>, scalar_prefetch = 0 : i64, scratch_operands = 0 : i64, tpu.core_type = #tpu.core_type<tc>, window_params = [{transform_indices = @transform_0, window_bounds = array<i64: 1, 1, 18, 18, 8>}, {pipeline_mode = #tpu.pipeline_mode<synchronous>, transform_indices = @transform_1, window_bounds = array<i64: 9, 8, 8>}, {pipeline_mode = #tpu.pipeline_mode<synchronous>, transform_indices = @transform_2, window_bounds = array<i64: 1, 8>}, {transform_indices = @transform_3, window_bounds = array<i64: 1, 8, 64>}]} {
    %cst = arith.constant 0.000000e+00 : f32
    %0 = vector.broadcast %cst : f32 to vector<64x8xf32>
    %c0 = arith.constant 0 : index
    %c0_0 = arith.constant 0 : index
    %c0_1 = arith.constant 0 : index
    %c0_2 = arith.constant 0 : index
    %c0_3 = arith.constant 0 : index
    %1 = vector.load %arg2[%c0, %c0_0, %c0_1, %c0_2, %c0_3] : memref<1x1x18x18x8xf32, #tpu.memory_space<vmem>>, vector<1x1x8x8x8xf32>
    %2 = vector.shape_cast %1 : vector<1x1x8x8x8xf32> to vector<8x8x8xf32>
    %3 = vector.shape_cast %2 : vector<8x8x8xf32> to vector<64x8xf32>
    %c0_4 = arith.constant 0 : index
    %c0_5 = arith.constant 0 : index
    %c0_6 = arith.constant 0 : index
    %4 = vector.load %arg3[%c0_4, %c0_5, %c0_6] : memref<9x8x8xf32, #tpu.memory_space<vmem>>, vector<1x8x8xf32>
    %5 = vector.shape_cast %4 : vector<1x8x8xf32> to vector<8x8xf32>
    %cst_7 = arith.constant dense<0.000000e+00> : vector<64x8xf32>
    %6 = tpu.matmul %3, %5, %cst_7 {dimension_numbers = #tpu.dot_dimension_numbers<[1], [0], [0], [1], [0, 0, 1, 1], [], []>} : vector<64x8xf32>, vector<8x8xf32>, vector<64x8xf32> -> vector<64x8xf32>
    %7 = arith.addf %0, %6 : vector<64x8xf32>
    %c0_8 = arith.constant 0 : index
    %c0_9 = arith.constant 0 : index
    %c0_10 = arith.constant 0 : index
    %c9 = arith.constant 9 : index
    %c0_11 = arith.constant 0 : index
    %8 = vector.load %arg2[%c0_8, %c0_9, %c0_10, %c9, %c0_11] : memref<1x1x18x18x8xf32, #tpu.memory_space<vmem>>, vector<1x1x8x8x8xf32>
    %9 = vector.shape_cast %8 : vector<1x1x8x8x8xf32> to vector<8x8x8xf32>
    %10 = vector.shape_cast %9 : vector<8x8x8xf32> to vector<64x8xf32>
    %c1 = arith.constant 1 : index
    %c0_12 = arith.constant 0 : index
    %c0_13 = arith.constant 0 : index
    %11 = vector.load %arg3[%c1, %c0_12, %c0_13] : memref<9x8x8xf32, #tpu.memory_space<vmem>>, vector<1x8x8xf32>
    %12 = vector.shape_cast %11 : vector<1x8x8xf32> to vector<8x8xf32>
    %cst_14 = arith.constant dense<0.000000e+00> : vector<64x8xf32>
    %13 = tpu.matmul %10, %12, %cst_14 {dimension_numbers = #tpu.dot_dimension_numbers<[1], [0], [0], [1], [0, 0, 1, 1], [], []>} : vector<64x8xf32>, vector<8x8xf32>, vector<64x8xf32> -> vector<64x8xf32>
    %14 = arith.addf %7, %13 : vector<64x8xf32>
    %c0_15 = arith.constant 0 : index
    %c0_16 = arith.constant 0 : index
    %c0_17 = arith.constant 0 : index
    %c1_18 = arith.constant 1 : index
    %c0_19 = arith.constant 0 : index
    %15 = vector.load %arg2[%c0_15, %c0_16, %c0_17, %c1_18, %c0_19] : memref<1x1x18x18x8xf32, #tpu.memory_space<vmem>>, vector<1x1x8x8x8xf32>
    %16 = vector.shape_cast %15 : vector<1x1x8x8x8xf32> to vector<8x8x8xf32>
    %17 = vector.shape_cast %16 : vector<8x8x8xf32> to vector<64x8xf32>
    %c2 = arith.constant 2 : index
    %c0_20 = arith.constant 0 : index
    %c0_21 = arith.constant 0 : index
    %18 = vector.load %arg3[%c2, %c0_20, %c0_21] : memref<9x8x8xf32, #tpu.memory_space<vmem>>, vector<1x8x8xf32>
    %19 = vector.shape_cast %18 : vector<1x8x8xf32> to vector<8x8xf32>
    %cst_22 = arith.constant dense<0.000000e+00> : vector<64x8xf32>
    %20 = tpu.matmul %17, %19, %cst_22 {dimension_numbers = #tpu.dot_dimension_numbers<[1], [0], [0], [1], [0, 0, 1, 1], [], []>} : vector<64x8xf32>, vector<8x8xf32>, vector<64x8xf32> -> vector<64x8xf32>
    %21 = arith.addf %14, %20 : vector<64x8xf32>
    %c0_23 = arith.constant 0 : index
    %c0_24 = arith.constant 0 : index
    %c9_25 = arith.constant 9 : index
    %c0_26 = arith.constant 0 : index
    %c0_27 = arith.constant 0 : index
    %22 = vector.load %arg2[%c0_23, %c0_24, %c9_25, %c0_26, %c0_27] : memref<1x1x18x18x8xf32, #tpu.memory_space<vmem>>, vector<1x1x8x8x8xf32>
    %23 = vector.shape_cast %22 : vector<1x1x8x8x8xf32> to vector<8x8x8xf32>
    %24 = vector.shape_cast %23 : vector<8x8x8xf32> to vector<64x8xf32>
    %c3 = arith.constant 3 : index
    %c0_28 = arith.constant 0 : index
    %c0_29 = arith.constant 0 : index
    %25 = vector.load %arg3[%c3, %c0_28, %c0_29] : memref<9x8x8xf32, #tpu.memory_space<vmem>>, vector<1x8x8xf32>
    %26 = vector.shape_cast %25 : vector<1x8x8xf32> to vector<8x8xf32>
    %cst_30 = arith.constant dense<0.000000e+00> : vector<64x8xf32>
    %27 = tpu.matmul %24, %26, %cst_30 {dimension_numbers = #tpu.dot_dimension_numbers<[1], [0], [0], [1], [0, 0, 1, 1], [], []>} : vector<64x8xf32>, vector<8x8xf32>, vector<64x8xf32> -> vector<64x8xf32>
    %28 = arith.addf %21, %27 : vector<64x8xf32>
    %c0_31 = arith.constant 0 : index
    %c0_32 = arith.constant 0 : index
    %c9_33 = arith.constant 9 : index
    %c9_34 = arith.constant 9 : index
    %c0_35 = arith.constant 0 : index
    %29 = vector.load %arg2[%c0_31, %c0_32, %c9_33, %c9_34, %c0_35] : memref<1x1x18x18x8xf32, #tpu.memory_space<vmem>>, vector<1x1x8x8x8xf32>
    %30 = vector.shape_cast %29 : vector<1x1x8x8x8xf32> to vector<8x8x8xf32>
    %31 = vector.shape_cast %30 : vector<8x8x8xf32> to vector<64x8xf32>
    %c4 = arith.constant 4 : index
    %c0_36 = arith.constant 0 : index
    %c0_37 = arith.constant 0 : index
    %32 = vector.load %arg3[%c4, %c0_36, %c0_37] : memref<9x8x8xf32, #tpu.memory_space<vmem>>, vector<1x8x8xf32>
    %33 = vector.shape_cast %32 : vector<1x8x8xf32> to vector<8x8xf32>
    %cst_38 = arith.constant dense<0.000000e+00> : vector<64x8xf32>
    %34 = tpu.matmul %31, %33, %cst_38 {dimension_numbers = #tpu.dot_dimension_numbers<[1], [0], [0], [1], [0, 0, 1, 1], [], []>} : vector<64x8xf32>, vector<8x8xf32>, vector<64x8xf32> -> vector<64x8xf32>
    %35 = arith.addf %28, %34 : vector<64x8xf32>
    %c0_39 = arith.constant 0 : index
    %c0_40 = arith.constant 0 : index
    %c9_41 = arith.constant 9 : index
    %c1_42 = arith.constant 1 : index
    %c0_43 = arith.constant 0 : index
    %36 = vector.load %arg2[%c0_39, %c0_40, %c9_41, %c1_42, %c0_43] : memref<1x1x18x18x8xf32, #tpu.memory_space<vmem>>, vector<1x1x8x8x8xf32>
    %37 = vector.shape_cast %36 : vector<1x1x8x8x8xf32> to vector<8x8x8xf32>
    %38 = vector.shape_cast %37 : vector<8x8x8xf32> to vector<64x8xf32>
    %c5 = arith.constant 5 : index
    %c0_44 = arith.constant 0 : index
    %c0_45 = arith.constant 0 : index
    %39 = vector.load %arg3[%c5, %c0_44, %c0_45] : memref<9x8x8xf32, #tpu.memory_space<vmem>>, vector<1x8x8xf32>
    %40 = vector.shape_cast %39 : vector<1x8x8xf32> to vector<8x8xf32>
    %cst_46 = arith.constant dense<0.000000e+00> : vector<64x8xf32>
    %41 = tpu.matmul %38, %40, %cst_46 {dimension_numbers = #tpu.dot_dimension_numbers<[1], [0], [0], [1], [0, 0, 1, 1], [], []>} : vector<64x8xf32>, vector<8x8xf32>, vector<64x8xf32> -> vector<64x8xf32>
    %42 = arith.addf %35, %41 : vector<64x8xf32>
    %c0_47 = arith.constant 0 : index
    %c0_48 = arith.constant 0 : index
    %c1_49 = arith.constant 1 : index
    %c0_50 = arith.constant 0 : index
    %c0_51 = arith.constant 0 : index
    %43 = vector.load %arg2[%c0_47, %c0_48, %c1_49, %c0_50, %c0_51] : memref<1x1x18x18x8xf32, #tpu.memory_space<vmem>>, vector<1x1x8x8x8xf32>
    %44 = vector.shape_cast %43 : vector<1x1x8x8x8xf32> to vector<8x8x8xf32>
    %45 = vector.shape_cast %44 : vector<8x8x8xf32> to vector<64x8xf32>
    %c6 = arith.constant 6 : index
    %c0_52 = arith.constant 0 : index
    %c0_53 = arith.constant 0 : index
    %46 = vector.load %arg3[%c6, %c0_52, %c0_53] : memref<9x8x8xf32, #tpu.memory_space<vmem>>, vector<1x8x8xf32>
    %47 = vector.shape_cast %46 : vector<1x8x8xf32> to vector<8x8xf32>
    %cst_54 = arith.constant dense<0.000000e+00> : vector<64x8xf32>
    %48 = tpu.matmul %45, %47, %cst_54 {dimension_numbers = #tpu.dot_dimension_numbers<[1], [0], [0], [1], [0, 0, 1, 1], [], []>} : vector<64x8xf32>, vector<8x8xf32>, vector<64x8xf32> -> vector<64x8xf32>
    %49 = arith.addf %42, %48 : vector<64x8xf32>
    %c0_55 = arith.constant 0 : index
    %c0_56 = arith.constant 0 : index
    %c1_57 = arith.constant 1 : index
    %c9_58 = arith.constant 9 : index
    %c0_59 = arith.constant 0 : index
    %50 = vector.load %arg2[%c0_55, %c0_56, %c1_57, %c9_58, %c0_59] : memref<1x1x18x18x8xf32, #tpu.memory_space<vmem>>, vector<1x1x8x8x8xf32>
    %51 = vector.shape_cast %50 : vector<1x1x8x8x8xf32> to vector<8x8x8xf32>
    %52 = vector.shape_cast %51 : vector<8x8x8xf32> to vector<64x8xf32>
    %c7 = arith.constant 7 : index
    %c0_60 = arith.constant 0 : index
    %c0_61 = arith.constant 0 : index
    %53 = vector.load %arg3[%c7, %c0_60, %c0_61] : memref<9x8x8xf32, #tpu.memory_space<vmem>>, vector<1x8x8xf32>
    %54 = vector.shape_cast %53 : vector<1x8x8xf32> to vector<8x8xf32>
    %cst_62 = arith.constant dense<0.000000e+00> : vector<64x8xf32>
    %55 = tpu.matmul %52, %54, %cst_62 {dimension_numbers = #tpu.dot_dimension_numbers<[1], [0], [0], [1], [0, 0, 1, 1], [], []>} : vector<64x8xf32>, vector<8x8xf32>, vector<64x8xf32> -> vector<64x8xf32>
    %56 = arith.addf %49, %55 : vector<64x8xf32>
    %c0_63 = arith.constant 0 : index
    %c0_64 = arith.constant 0 : index
    %c1_65 = arith.constant 1 : index
    %c1_66 = arith.constant 1 : index
    %c0_67 = arith.constant 0 : index
    %57 = vector.load %arg2[%c0_63, %c0_64, %c1_65, %c1_66, %c0_67] : memref<1x1x18x18x8xf32, #tpu.memory_space<vmem>>, vector<1x1x8x8x8xf32>
    %58 = vector.shape_cast %57 : vector<1x1x8x8x8xf32> to vector<8x8x8xf32>
    %59 = vector.shape_cast %58 : vector<8x8x8xf32> to vector<64x8xf32>
    %c8 = arith.constant 8 : index
    %c0_68 = arith.constant 0 : index
    %c0_69 = arith.constant 0 : index
    %60 = vector.load %arg3[%c8, %c0_68, %c0_69] : memref<9x8x8xf32, #tpu.memory_space<vmem>>, vector<1x8x8xf32>
    %61 = vector.shape_cast %60 : vector<1x8x8xf32> to vector<8x8xf32>
    %cst_70 = arith.constant dense<0.000000e+00> : vector<64x8xf32>
    %62 = tpu.matmul %59, %61, %cst_70 {dimension_numbers = #tpu.dot_dimension_numbers<[1], [0], [0], [1], [0, 0, 1, 1], [], []>} : vector<64x8xf32>, vector<8x8xf32>, vector<64x8xf32> -> vector<64x8xf32>
    %63 = arith.addf %56, %62 : vector<64x8xf32>
    %c0_71 = arith.constant 0 : index
    %c0_72 = arith.constant 0 : index
    %64 = vector.load %arg4[%c0_71, %c0_72] : memref<1x8xf32, #tpu.memory_space<vmem>>, vector<1x8xf32>
    %65 = vector.broadcast %64 : vector<1x8xf32> to vector<64x8xf32>
    %66 = arith.addf %63, %65 : vector<64x8xf32>
    %67 = tpu.transpose %66, [1, 0] : vector<64x8xf32> -> vector<8x64xf32>
    %c0_73 = arith.constant 0 : index
    %c0_74 = arith.constant 0 : index
    %c0_75 = arith.constant 0 : index
    %68 = vector.load %arg5[%c0_73, %c0_74, %c0_75] : memref<1x8x64xf32, #tpu.memory_space<vmem>>, vector<1x8x64xf32>
    %69 = vector.shape_cast %68 : vector<1x8x64xf32> to vector<8x64xf32>
    %70 = vector.shape_cast %67 : vector<8x64xf32> to vector<1x8x64xf32>
    tpu.vector_store %arg5[%c0_73, %c0_74, %c0_75], %70 {strides = array<i32>} : memref<1x8x64xf32, #tpu.memory_space<vmem>>, vector<1x8x64xf32>,
    return
  }
  func.func @transform_0(%arg0: i32, %arg1: i32) -> (i32, i32, i32, i32, i32) {
    %c0_i32 = arith.constant 0 : i32
    %c0_i32_0 = arith.constant 0 : i32
    %c0_i32_1 = arith.constant 0 : i32
    %c0_i32_2 = arith.constant 0 : i32
    return %arg0, %arg1, %c0_i32, %c0_i32_0, %c0_i32_1 : i32, i32, i32, i32, i32
  }
  func.func @transform_1(%arg0: i32, %arg1: i32) -> (i32, i32, i32) {
    %c0_i32 = arith.constant 0 : i32
    %c0_i32_0 = arith.constant 0 : i32
    %c0_i32_1 = arith.constant 0 : i32
    %c0_i32_2 = arith.constant 0 : i32
    return %c0_i32, %c0_i32_0, %c0_i32_1 : i32, i32, i32
  }
  func.func @transform_2(%arg0: i32, %arg1: i32) -> (i32, i32) {
    %c0_i32 = arith.constant 0 : i32
    %c0_i32_0 = arith.constant 0 : i32
    %c0_i32_1 = arith.constant 0 : i32
    return %c0_i32, %c0_i32_0 : i32, i32
  }
  func.func @transform_3(%arg0: i32, %arg1: i32) -> (i32, i32, i32) {
    %c0_i32 = arith.constant 0 : i32
    %c0_i32_0 = arith.constant 0 : i32
    return %arg0, %c0_i32, %arg1 : i32, i32, i32
  }
}

</mosaic_0001>

<bundles_post_ra>
// kernel: downsample_pallas.1
= control target key start
LH: loop header
LB: loop body
LE: loop exit
PB: predicated region body
PF: predicated region fallthrough
CT: control target
= control target key end

     0   :  { %s1273_s12 = smov 0   ;;  %s1275_s13 = smov 0   ;;  %s1566_s0 = inlined_call_operand.vmem [shape: f32[2,1,18,18,8], index: 0, kind: input, shape index: {}]   ;;  %s1567_s1 = inlined_call_operand.vmem [shape: f32[9,8,8], index: 1, kind: input, shape index: {}]   ;;  %s1568_s2 = inlined_call_operand.vmem [shape: f32[1,8], index: 2, kind: input, shape index: {}]   ;;  %s1569_s3 = inlined_call_operand.vmem [shape: f32[2,8,64], index: 3, kind: output, shape index: {}]  }
   0x1   :  { %s1277_s14 = smov 0  }
   0x2 LB: > { %s25_s15 = sadd.s32 1, %s1247_s13  ;;  %p1066_p0 = scmp.ge.s32.totalorder %s1251_s14, 1  ;;  %s1251_s14 = sphi %s1277_s14, %s13_s14   ;;  %s1247_s13 = sphi %s1275_s13, %s1571_s13   ;;  %s1243_s12 = sphi %s1273_s12, %s1570_s12  }
   0x3   : > { %p27_p1 = scmp.ge.s32.totalorder %s25_s15, 2  ;;  %p157_p2 = scmp.lt.s32.totalorder %s1251_s14, 3 }
   0x5   : > { %s1573_s15 = smov (%p27_p1, %s25_s15), 0  ;;  %p158_p3 = pnand %p1066_p0, %p157_p2 }
   0x6   : > { %p187_p4 = scmp.lt.s32.totalorder (!%p158_p3), %s1243_s12, 1 }
   0x7   : > { %161 = sbr.rel (%p158_p3) target bundleno = 403 (0x193), region = 32 }
   0xc   : > { %v1069_v0 = vld [vmem:[%s1567_s1 + $0x8] sm:$0xff]  ;;  %v1086_v1 = vld [vmem:[%s1567_s1 + $0x10] sm:$0xff]  ;;  %v1103_v2 = vld [vmem:[%s1567_s1 + $0x18] sm:$0xff]  ;;  %s1575_s12 = smov (!%p187_p4, %s1243_s12), 1  ;;  %vm222_vm0 = vcmask 64512   ;;  %vm980_vm1 = vcmask 523264  }
   0xd   : > { %1199 = vmatpush.msra.mxu1 %v1069_v0  ;;  %1200 = vmatpush.msra.mxu2 %v1069_v0  ;;  %v211_v3 = vld [vmem:[%s1567_s1] sm:$0xff]  ;;  %s1202_s26 = smul.u32 432, %s1575_s12  ;;  %v1154_v5 = vld [vmem:[%s1567_s1 + $0x30] sm:$0xff]  ;;  %v1171_v6 = vld [vmem:[%s1567_s1 + $0x38] sm:$0xff]  ;;  %s1068_s17 = sshll.u32 %s1575_s12, 3 }
   0xe   : > { %1201 = vmatpush.msra.mxu3 %v1069_v0  ;;  %v1120_v4 = vld [vmem:[%s1567_s1 + $0x20] sm:$0xff]  ;;  %262 = vmatpush.msra.mxu0 %v1069_v0  ;;  %v1137_v11 = vld [vmem:[%s1567_s1 + $0x28] sm:$0xff]  ;;  %s202_s20 = scalar_lea.vmem %s1569_s3, %s1068_s17 }
   0xf   : > { %402 = vmatpush.msrb.mxu2 %v1086_v1  ;;  %327 = vmatpush.msrb.mxu1 %v211_v3  ;;  %s1312_s29 = scalar_lea.vmem %s1566_s0, %s1202_s26  ;;  %v1188_v12 = vld [vmem:[%s1567_s1 + $0x40] sm:$0xff] }
  0x10   : > { %486 = vmatpush.msrb.mxu3 %v1103_v2  ;;  %569 = vmatpush.msrb.mxu0 %v1120_v4  ;;  %v1321_v7 = vld [vmem:[%s1312_s29 + $0x39] sm:$0xff]  ;;  %v1324_v8 = vld [vmem:[%s1312_s29 + $0x69] sm:$0xff]  ;;  %v1344_v13 = vld [vmem:[%s1312_s29 + $0x51] sm:$0xff] }
  0x11   : > { %v1327_v9 = vld [vmem:[%s1312_s29 + $0x99] sm:$0xff]  ;;  %1072 = vmatmul.msk.f32.vlgmr.msra.gmra.mxu1 %vm222_vm0, %v1321_v7  ;;  %1074 = vmatmul.msk.f32.vlgmr.msra.gmra.mxu2 %vm222_vm0, %v1324_v8  ;;  %v212_v10 = vld [vmem:[%s1312_s29 + $0x9] sm:$0xff]  ;;  %v1347_v14 = vld [vmem:[%s1312_s29 + $0x81] sm:$0xff] }
  0x12   : > { %1076 = vmatmul.msk.f32.vlgmr.msra.gmra.mxu3 %vm222_vm0, %v1327_v9  ;;  %1070 = vmatmul.msk.f32.vlgmr.msra.gmra.mxu0 %vm222_vm0, %v212_v10  ;;  %v1350_v15 = vld [vmem:[%s1312_s29 + $0xb1] sm:$0xff]  ;;  %v1353_v16 = vld [vmem:[%s1312_s29 + $0x21] sm:$0xff]  ;;  %v354_v22 = vld [vmem:[%s1312_s29 + $0x19] sm:$0xff] }
  0x13   : > { %736 = vmatpush.msra.mxu2 %v1154_v5  ;;  %819 = vmatpush.msra.mxu3 %v1171_v6  ;;  %v203_v17 = vld [vmem:[%s1312_s29] sm:$0xff]  ;;  %v1095_v19 = vld [vmem:[%s1312_s29 + $0xd8] sm:$0xff]  ;;  %v1096_v23 = vld [vmem:[%s1312_s29 + $0xf0] sm:$0xff] }
  0x14   : > { %652 = vmatpush.msra.mxu1 %v1137_v11  ;;  %902 = vmatpush.msra.mxu0 %v1188_v12  ;;  %v353_v18 = vld [vmem:[%s1312_s29 + $0x1] sm:$0xff]  ;;  %v204_v21 = vld [vmem:[%s1312_s29 + $0x18] sm:$0xff]  ;;  %v205_v25 = vld [vmem:[%s1312_s29 + $0x30] sm:$0xff] }
  0x15   : > { %v1112_v20 = vld [vmem:[%s1312_s29 + $0xe1] sm:$0xff]  ;;  %v1113_v24 = vld [vmem:[%s1312_s29 + $0xf9] sm:$0xff]  ;;  %v355_v26 = vld [vmem:[%s1312_s29 + $0x31] sm:$0xff] }
  0x16   : > { %v1097_v27 = vld [vmem:[%s1312_s29 + $0x108] sm:$0xff]  ;;  %v1114_v28 = vld [vmem:[%s1312_s29 + $0x111] sm:$0xff]  ;;  %v1098_v31 = vld [vmem:[%s1312_s29 + $0x120] sm:$0xff] }
  0x17   : > { %v206_v29 = vld [vmem:[%s1312_s29 + $0x48] sm:$0xff]  ;;  %v207_v33 = vld [vmem:[%s1312_s29 + $0x60] sm:$0xff]  ;;  %v1099_v35 = vld [vmem:[%s1312_s29 + $0x138] sm:$0xff] }
  0x18   : > { %v356_v30 = vld [vmem:[%s1312_s29 + $0x49] sm:$0xff]  ;;  %v357_v34 = vld [vmem:[%s1312_s29 + $0x61] sm:$0xff]  ;;  %v208_v37 = vld [vmem:[%s1312_s29 + $0x78] sm:$0xff] }
  0x19   : > { %1073 = vmatmul.msk.f32.gmra.mxu1 %vm222_vm0, %v1344_v13  ;;  %1075 = vmatmul.msk.f32.gmra.mxu2 %vm222_vm0, %v1347_v14  ;;  %v1115_v32 = vld [vmem:[%s1312_s29 + $0x129] sm:$0xff]  ;;  %v1116_v36 = vld [vmem:[%s1312_s29 + $0x141] sm:$0xff]  ;;  %v358_v38 = vld [vmem:[%s1312_s29 + $0x79] sm:$0xff] }
  0x1a   : > { %1077 = vmatmul.msk.f32.gmra.mxu3 %vm222_vm0, %v1350_v15  ;;  %1071 = vmatmul.msk.f32.gmra.mxu0 %vm222_vm0, %v1353_v16  ;;  %v1100_v39 = vld [vmem:[%s1312_s29 + $0x150] sm:$0xff]  ;;  %v1117_v40 = vld [vmem:[%s1312_s29 + $0x159] sm:$0xff]  ;;  %v1101_v43 = vld [vmem:[%s1312_s29 + $0x168] sm:$0xff] }
  0x1b   : > { %v209_v41 = vld [vmem:[%s1312_s29 + $0x90] sm:$0xff]  ;;  %v210_v45 = vld [vmem:[%s1312_s29 + $0xa8] sm:$0xff]  ;;  %v1102_v47 = vld [vmem:[%s1312_s29 + $0x180] sm:$0xff] }
  0x1c   : > { %v359_v42 = vld [vmem:[%s1312_s29 + $0x91] sm:$0xff]  ;;  %v360_v46 = vld [vmem:[%s1312_s29 + $0xa9] sm:$0xff]  ;;  %v1129_v49 = vld [vmem:[%s1312_s29 + $0xd9] sm:$0xff] }
  0x1d   : > { %v1118_v44 = vld [vmem:[%s1312_s29 + $0x171] sm:$0xff]  ;;  %v1119_v48 = vld [vmem:[%s1312_s29 + $0x189] sm:$0xff]  ;;  %v1132_v52 = vld [vmem:[%s1312_s29 + $0x121] sm:$0xff] }
  0x1e   : > { %v1130_v50 = vld [vmem:[%s1312_s29 + $0xf1] sm:$0xff]  ;;  %v1131_v51 = vld [vmem:[%s1312_s29 + $0x109] sm:$0xff]  ;;  %v1133_v53 = vld [vmem:[%s1312_s29 + $0x139] sm:$0xff] }
  0x1f   : > { %v1134_v54 = vld [vmem:[%s1312_s29 + $0x151] sm:$0xff]  ;;  %v1135_v56 = vld [vmem:[%s1312_s29 + $0x169] sm:$0xff]  ;;  %v1136_v61 = vld [vmem:[%s1312_s29 + $0x181] sm:$0xff] }
  0x20   : > { %v1153_v62 = vld [vmem:[%s1312_s29 + $0xc0] sm:$0xff]  ;;  %v1170_v63 = vld [vmem:[%s1312_s29 + $0xc9] sm:$0xff] }
  0x21   : > { %1078 = vmatmul.msk.f32.vlgmr.msrb.gmra.mxu1 %vm222_vm0, %v203_v17  ;;  %1087 = vmatmul.msk.f32.vlgmr.msrb.gmra.mxu2 %vm222_vm0, %v353_v18  ;;  %v1187_v1 = vld [vmem:[%s1312_s29 + $0xc1] sm:$0xff] }
  0x22   : > { %1104 = vmatmul.msk.f32.vlgmr.msrb.gmra.mxu3 %vm222_vm0, %v1095_v19  ;;  %1121 = vmatmul.msk.f32.vlgmr.msrb.gmra.mxu0 %vm222_vm0, %v1112_v20 }
  0x29   : > { %1079 = vmatmul.msk.f32.gmra.mxu1 %vm222_vm0, %v204_v21  ;;  %1088 = vmatmul.msk.f32.gmra.mxu2 %vm222_vm0, %v354_v22 }
  0x2a   : > { %1105 = vmatmul.msk.f32.gmra.mxu3 %vm222_vm0, %v1096_v23  ;;  %1122 = vmatmul.msk.f32.gmra.mxu0 %vm222_vm0, %v1113_v24 }
  0x31   : > { %1080 = vmatmul.msk.f32.gmra.mxu1 %vm222_vm0, %v205_v25  ;;  %1089 = vmatmul.msk.f32.gmra.mxu2 %vm222_vm0, %v355_v26 }
  0x32   : > { %1106 = vmatmul.msk.f32.gmra.mxu3 %vm222_vm0, %v1097_v27  ;;  %1123 = vmatmul.msk.f32.gmra.mxu0 %vm222_vm0, %v1114_v28 }
  0x39   : > { %1081 = vmatmul.msk.f32.gmra.mxu1 %vm222_vm0, %v206_v29  ;;  %1090 = vmatmul.msk.f32.gmra.mxu2 %vm222_vm0, %v356_v30 }
  0x3a   : > { %1107 = vmatmul.msk.f32.gmra.mxu3 %vm222_vm0, %v1098_v31  ;;  %1124 = vmatmul.msk.f32.gmra.mxu0 %vm222_vm0, %v1115_v32 }
  0x41   : > { %1082 = vmatmul.msk.f32.gmra.mxu1 %vm222_vm0, %v207_v33  ;;  %1091 = vmatmul.msk.f32.gmra.mxu2 %vm222_vm0, %v357_v34 }
  0x42   : > { %1108 = vmatmul.msk.f32.gmra.mxu3 %vm222_vm0, %v1099_v35  ;;  %1125 = vmatmul.msk.f32.gmra.mxu0 %vm222_vm0, %v1116_v36 }
  0x49   : > { %1083 = vmatmul.msk.f32.gmra.mxu1 %vm222_vm0, %v208_v37  ;;  %1092 = vmatmul.msk.f32.gmra.mxu2 %vm222_vm0, %v358_v38 }
  0x4a   : > { %1109 = vmatmul.msk.f32.gmra.mxu3 %vm222_vm0, %v1100_v39  ;;  %1126 = vmatmul.msk.f32.gmra.mxu0 %vm222_vm0, %v1117_v40 }
  0x51   : > { %1084 = vmatmul.msk.f32.gmra.mxu1 %vm222_vm0, %v209_v41  ;;  %1093 = vmatmul.msk.f32.gmra.mxu2 %vm222_vm0, %v359_v42 }
  0x52   : > { %1110 = vmatmul.msk.f32.gmra.mxu3 %vm222_vm0, %v1101_v43  ;;  %1127 = vmatmul.msk.f32.gmra.mxu0 %vm222_vm0, %v1118_v44 }
  0x59   : > { %1085 = vmatmul.msk.f32.gmra.mxu1 %vm222_vm0, %v210_v45  ;;  %1094 = vmatmul.msk.f32.gmra.mxu2 %vm222_vm0, %v360_v46 }
  0x5a   : > { %1111 = vmatmul.msk.f32.gmra.mxu3 %vm222_vm0, %v1102_v47  ;;  %1128 = vmatmul.msk.f32.gmra.mxu0 %vm222_vm0, %v1119_v48 }
  0x61   : > { %1138 = vmatmul.msk.f32.vlgmr.msra.gmra.mxu1 %vm222_vm0, %v1129_v49  ;;  %1155 = vmatmul.msk.f32.vlgmr.msra.gmra.mxu2 %vm222_vm0, %v204_v21 }
  0x62   : > { %1172 = vmatmul.msk.f32.vlgmr.msra.gmra.mxu3 %vm222_vm0, %v1353_v16  ;;  %1189 = vmatmul.msk.f32.vlgmr.msra.gmra.mxu0 %vm222_vm0, %v354_v22 }
  0x69   : > { %1139 = vmatmul.msk.f32.gmra.mxu1 %vm222_vm0, %v1130_v50  ;;  %1156 = vmatmul.msk.f32.gmra.mxu2 %vm222_vm0, %v205_v25 }
  0x6a   : > { %1173 = vmatmul.msk.f32.gmra.mxu3 %vm222_vm0, %v1321_v7  ;;  %1190 = vmatmul.msk.f32.gmra.mxu0 %vm222_vm0, %v355_v26 }
  0x71   : > { %1140 = vmatmul.msk.f32.gmra.mxu1 %vm222_vm0, %v1131_v51  ;;  %1157 = vmatmul.msk.f32.gmra.mxu2 %vm222_vm0, %v206_v29 }
  0x72   : > { %1174 = vmatmul.msk.f32.gmra.mxu3 %vm222_vm0, %v1344_v13  ;;  %1191 = vmatmul.msk.f32.gmra.mxu0 %vm222_vm0, %v356_v30 }
  0x79   : > { %1141 = vmatmul.msk.f32.gmra.mxu1 %vm222_vm0, %v1132_v52  ;;  %1158 = vmatmul.msk.f32.gmra.mxu2 %vm222_vm0, %v207_v33  ;;  %v1523_v52 = vld [vmem:[%s1568_s2] ss:$0 sm:$0xff] }
  0x7a   : > { %1175 = vmatmul.msk.f32.gmra.mxu3 %vm222_vm0, %v1324_v8  ;;  %1192 = vmatmul.msk.f32.gmra.mxu0 %vm222_vm0, %v357_v34 }
  0x81   : > { %1142 = vmatmul.msk.f32.gmra.mxu1 %vm222_vm0, %v1133_v53  ;;  %1159 = vmatmul.msk.f32.gmra.mxu2 %vm222_vm0, %v208_v37 }
  0x82   : > { %1176 = vmatmul.msk.f32.gmra.mxu3 %vm222_vm0, %v1347_v14  ;;  %1193 = vmatmul.msk.f32.gmra.mxu0 %vm222_vm0, %v358_v38 }
  0x89   : > { %1143 = vmatmul.msk.f32.gmra.mxu1 %vm222_vm0, %v1134_v54  ;;  %1160 = vmatmul.msk.f32.gmra.mxu2 %vm222_vm0, %v209_v41 }
  0x8a   : > { %1177 = vmatmul.msk.f32.gmra.mxu3 %vm222_vm0, %v1327_v9  ;;  %1194 = vmatmul.msk.f32.gmra.mxu0 %vm222_vm0, %v359_v42 }
  0x8e   : > { %v1463_v55 = vpop.f32.mrf.mxu1 }
  0x8f   : > { %v264_v57 = vpop.f32.mrf.mxu0 }
  0x91   : > { %1144 = vmatmul.msk.f32.gmra.mxu1 %vm222_vm0, %v1135_v56  ;;  %1161 = vmatmul.msk.f32.gmra.mxu2 %vm222_vm0, %v210_v45 }
  0x92   : > { %1178 = vmatmul.msk.f32.gmra.mxu3 %vm222_vm0, %v1350_v15  ;;  %1195 = vmatmul.msk.f32.gmra.mxu0 %vm222_vm0, %v360_v46 }
  0x94   : > { %v1471_v58 = vpop.f32.mrf.mxu2 }
  0x95   : > { %v1473_v59 = vpop.f32.mrf.mxu3 }
  0x96   : > { %v1475_v60 = vpop.f32.mrf.mxu1 }
  0x97   : > { %v267_v0 = vpop.f32.mrf.mxu0 }
  0x99   : > { %1145 = vmatmul.msk.f32.gmra.mxu1 %vm222_vm0, %v1136_v61  ;;  %1162 = vmatmul.msk.f32.gmra.mxu2 %vm222_vm0, %v1153_v62 }
  0x9a   : > { %1179 = vmatmul.msk.f32.gmra.mxu3 %vm222_vm0, %v1170_v63  ;;  %1196 = vmatmul.msk.f32.gmra.mxu0 %vm222_vm0, %v1187_v1 }
  0x9c   : > { %v1485_v2 = vpop.f32.mrf.mxu2 }
  0x9d   : > { %v1487_v3 = vpop.f32.mrf.mxu3 }
  0x9e   : > { %v329_v4 = vpop.f32.mrf.mxu1 }
  0x9f   : > { %v571_v5 = vpop.f32.mrf.mxu0  ;;  %v330_v33 = vadd.f32 %v329_v4, %v264_v57 }
  0xa4   : > { %v404_v6 = vpop.f32.mrf.mxu2 }
  0xa5   : > { %v488_v7 = vpop.f32.mrf.mxu3  ;;  %v428_v35 = vadd.f32 %v404_v6, %v330_v33 }
  0xa6   : > { %v332_v8 = vpop.f32.mrf.mxu1 }
  0xa7   : > { %v574_v9 = vpop.f32.mrf.mxu0  ;;  %v512_v37 = vadd.f32 %v488_v7, %v428_v35  ;;  %v333_v40 = vadd.f32 %v332_v8, %v267_v0 }
  0xa9   : > { %v595_v42 = vadd.f32 %v571_v5, %v512_v37 }
  0xac   : > { %v407_v10 = vpop.f32.mrf.mxu2 }
  0xad   : > { %v491_v11 = vpop.f32.mrf.mxu3  ;;  %v429_v43 = vadd.f32 %v407_v10, %v333_v40 }
  0xae   : > { %v335_v12 = vpop.f32.mrf.mxu1 }
  0xaf   : > { %v577_v13 = vpop.f32.mrf.mxu0  ;;  %v513_v46 = vadd.f32 %v491_v11, %v429_v43  ;;  %v336_v50 = vadd.f32 %v335_v12, %v1463_v55 }
  0xb1   : > { %v596_v54 = vadd.f32 %v574_v9, %v513_v46 }
  0xb4   : > { %v410_v14 = vpop.f32.mrf.mxu2 }
  0xb5   : > { %v494_v15 = vpop.f32.mrf.mxu3  ;;  %v430_v56 = vadd.f32 %v410_v14, %v336_v50 }
  0xb6   : > { %v338_v16 = vpop.f32.mrf.mxu1 }
  0xb7   : > { %v1489_v17 = vpop.f32.mrf.mxu0  ;;  %v514_v0 = vadd.f32 %v494_v15, %v430_v56  ;;  %v339_v55 = vadd.f32 %v338_v16, %v1475_v60 }
  0xb9   : > { %v597_v8 = vadd.f32 %v577_v13, %v514_v0 }
  0xbc   : > { %v413_v18 = vpop.f32.mrf.mxu2 }
  0xbd   : > { %v497_v19 = vpop.f32.mrf.mxu3  ;;  %v431_v10 = vadd.f32 %v413_v18, %v339_v55 }
  0xbe   : > { %v341_v20 = vpop.f32.mrf.mxu1 }
  0xbf   : > { %v1491_v21 = vpop.f32.mrf.mxu0  ;;  %v515_v33 = vadd.f32 %v497_v19, %v431_v10 }
  0xc1   : > { %v598_v60 = vadd.f32 %v1489_v17, %v515_v33 }
  0xc4   : > { %v416_v22 = vpop.f32.mrf.mxu2 }
  0xc5   : > { %v1493_v23 = vpop.f32.mrf.mxu3 }
  0xc6   : > { %v1495_v24 = vpop.f32.mrf.mxu1 }
  0xc7   : > { %v1497_v25 = vpop.f32.mrf.mxu0 }
  0xcc   : > { %v1499_v26 = vpop.f32.mrf.mxu2 }
  0xcd   : > { %v1501_v27 = vpop.f32.mrf.mxu3 }
  0xce   : > { %v1503_v28 = vpop.f32.mrf.mxu1 }
  0xcf   : > { %v1505_v29 = vpop.f32.mrf.mxu0 }
  0xd4   : > { %v1507_v30 = vpop.f32.mrf.mxu2 }
  0xd5   : > { %v1509_v31 = vpop.f32.mrf.mxu3 }
  0xd6   : > { %v1511_v32 = vpop.f32.mrf.mxu1 }
  0xd7   : > { %v1513_v34 = vpop.f32.mrf.mxu0 }
  0xdc   : > { %v1515_v36 = vpop.f32.mrf.mxu2 }
  0xdd   : > { %v1517_v38 = vpop.f32.mrf.mxu3 }
  0xde   : > { %v654_v39 = vpop.f32.mrf.mxu1 }
  0xdf   : > { %v904_v41 = vpop.f32.mrf.mxu0  ;;  %v678_v44 = vadd.f32 %v654_v39, %v595_v42  ;;  %v342_v39 = vadd.f32 %v341_v20, %v1471_v58 }
  0xe1   : > { %v432_v16 = vadd.f32 %v416_v22, %v342_v39 }
  0xe4   : > { %v738_v45 = vpop.f32.mrf.mxu2 }
  0xe5   : > { %v762_v47 = vadd.f32 %v738_v45, %v678_v44  ;;  %v821_v48 = vpop.f32.mrf.mxu3  ;;  %v516_v44 = vadd.f32 %v1493_v23, %v432_v16 }
  0xe6   : > { %v657_v49 = vpop.f32.mrf.mxu1 }
  0xe7   : > { %v845_v51 = vadd.f32 %v821_v48, %v762_v47  ;;  %v907_v53 = vpop.f32.mrf.mxu0  ;;  %v679_v61 = vadd.f32 %v657_v49, %v596_v54  ;;  %v345_v47 = vadd.f32 %v1495_v24, %v1485_v2  ;;  %v599_v48 = vadd.f32 %v1491_v21, %v516_v44 }
  0xe8   : > { %v348_v2 = vadd.f32 %v1503_v28, %v1473_v59  ;;  %v351_v59 = vadd.f32 %v1511_v32, %v1487_v3 }
  0xe9   : > { %v928_v57 = vadd.f32 %v904_v41, %v845_v51  ;;  %v433_v17 = vadd.f32 %v1499_v26, %v345_v47 }
  0xea   : > { %v434_v21 = vadd.f32 %v1507_v30, %v348_v2  ;;  %v435_v30 = vadd.f32 %v1515_v36, %v351_v59 }
  0xeb   : > { %v940_v62 = vadd.f32 %v1523_v52, %v928_v57  ;;  %v517_v23 = vadd.f32 %v1501_v27, %v433_v17 }
  0xec   : > { %v741_v63 = vpop.f32.mrf.mxu2  ;;  %v518_v27 = vadd.f32 %v1509_v31, %v434_v21  ;;  %v519_v31 = vadd.f32 %v1517_v38, %v435_v30 }
  0xed   : > { %v763_v1 = vadd.f32 %v741_v63, %v679_v61  ;;  %948 = vxpose.xlu0.b32.start [1/8] (short) (narrow) %v940_v62, 8  ;;  %v824_v4 = vpop.f32.mrf.mxu3  ;;  %v600_v57 = vadd.f32 %v1497_v25, %v517_v23 }
  0xee   : > { %v660_v5 = vpop.f32.mrf.mxu1  ;;  %v601_v25 = vadd.f32 %v1505_v29, %v518_v27  ;;  %v602_v3 = vadd.f32 %v1513_v34, %v519_v31 }
  0xef   : > { %v846_v6 = vadd.f32 %v824_v4, %v763_v1  ;;  %v910_v7 = vpop.f32.mrf.mxu0  ;;  %v680_v12 = vadd.f32 %v660_v5, %v597_v8 }
  0xf1   : > { %v929_v11 = vadd.f32 %v907_v53, %v846_v6 }
  0xf3   : > { %v941_v9 = vadd.f32 %v1523_v52, %v929_v11 }
  0xf4   : > { %v744_v14 = vpop.f32.mrf.mxu2 }
  0xf5   : > { %v764_v35 = vadd.f32 %v744_v14, %v680_v12  ;;  %949 = vxpose.xlu0.b32.cont [2/8] (short) (narrow) %v941_v9, 8  ;;  %v827_v37 = vpop.f32.mrf.mxu3 }
  0xf6   : > { %v663_v15 = vpop.f32.mrf.mxu1 }
  0xf7   : > { %v847_v40 = vadd.f32 %v827_v37, %v764_v35  ;;  %v913_v41 = vpop.f32.mrf.mxu0  ;;  %v681_v13 = vadd.f32 %v663_v15, %v598_v60 }
  0xf9   : > { %v930_v42 = vadd.f32 %v910_v7, %v847_v40 }
  0xfb   : > { %v942_v18 = vadd.f32 %v1523_v52, %v930_v42 }
  0xfc   : > { %v747_v43 = vpop.f32.mrf.mxu2 }
  0xfd   : > { %v765_v45 = vadd.f32 %v747_v43, %v681_v13  ;;  %950 = vxpose.xlu0.b32.cont [3/8] (short) (narrow) %v942_v18, 8  ;;  %v830_v19 = vpop.f32.mrf.mxu3 }
  0xfe   : > { %v666_v46 = vpop.f32.mrf.mxu1 }
  0xff   : > { %v848_v58 = vadd.f32 %v830_v19, %v765_v45  ;;  %v916_v20 = vpop.f32.mrf.mxu0  ;;  %v682_v49 = vadd.f32 %v666_v46, %v599_v48 }
 0x101   : > { %v931_v22 = vadd.f32 %v913_v41, %v848_v58 }
 0x103   : > { %v943_v50 = vadd.f32 %v1523_v52, %v931_v22 }
 0x104   : > { %v750_v51 = vpop.f32.mrf.mxu2 }
 0x105   : > { %v766_v53 = vadd.f32 %v750_v51, %v682_v49  ;;  %951 = vxpose.xlu0.b32.cont [4/8] (short) (narrow) %v943_v50, 8  ;;  %v833_v54 = vpop.f32.mrf.mxu3 }
 0x106   : > { %v669_v56 = vpop.f32.mrf.mxu1 }
 0x107   : > { %v849_v24 = vadd.f32 %v833_v54, %v766_v53  ;;  %v919_v61 = vpop.f32.mrf.mxu0  ;;  %v683_v62 = vadd.f32 %v669_v56, %v600_v57 }
 0x109   : > { %v932_v26 = vadd.f32 %v916_v20, %v849_v24 }
 0x10b   : > { %v944_v63 = vadd.f32 %v1523_v52, %v932_v26 }
 0x10c   : > { %v753_v0 = vpop.f32.mrf.mxu2 }
 0x10d   : > { %v767_v1 = vadd.f32 %v753_v0, %v683_v62  ;;  %952 = vxpose.xlu0.b32.cont [5/8] (short) (narrow) %v944_v63, 8  ;;  %v836_v4 = vpop.f32.mrf.mxu3 }
 0x10e   : > { %v672_v5 = vpop.f32.mrf.mxu1 }
 0x10f   : > { %v850_v28 = vadd.f32 %v836_v4, %v767_v1  ;;  %v684_v6 = vadd.f32 %v672_v5, %v601_v25  ;;  %v922_v10 = vpop.f32.mrf.mxu0 }
 0x111   : > { %v933_v55 = vadd.f32 %v919_v61, %v850_v28 }
 0x113   : > { %v945_v7 = vadd.f32 %v1523_v52, %v933_v55 }
 0x114   : > { %v756_v8 = vpop.f32.mrf.mxu2 }
 0x115   : > { %v768_v11 = vadd.f32 %v756_v8, %v684_v6  ;;  %953 = vxpose.xlu0.b32.cont [6/8] (short) (narrow) %v945_v7, 8  ;;  %v839_v12 = vpop.f32.mrf.mxu3 }
 0x116   : > { %v675_v14 = vpop.f32.mrf.mxu1 }
 0x117   : > { %v851_v9 = vadd.f32 %v839_v12, %v768_v11  ;;  %v685_v29 = vadd.f32 %v675_v14, %v602_v3  ;;  %v925_v15 = vpop.f32.mrf.mxu0 }
 0x119   : > { %v934_v32 = vadd.f32 %v922_v10, %v851_v9 }
 0x11b   : > { %v946_v36 = vadd.f32 %v1523_v52, %v934_v32 }
 0x11c   : > { %v759_v33 = vpop.f32.mrf.mxu2 }
 0x11d   : > { %v769_v35 = vadd.f32 %v759_v33, %v685_v29  ;;  %954 = vxpose.xlu0.b32.cont [7/8] (short) (narrow) %v946_v36, 8  ;;  %v842_v37 = vpop.f32.mrf.mxu3 }
 0x11f   : > { %v852_v39 = vadd.f32 %v842_v37, %v769_v35 }
 0x121   : > { %v935_v40 = vadd.f32 %v925_v15, %v852_v39 }
 0x123   : > { %v947_v38 = vadd.f32 %v1523_v52, %v935_v40 }
 0x125   : > { %955 = vxpose.xlu0.b32.end [8/8] (short) (narrow) %v947_v38, 8 }
 0x191   : > { %v964_v34 = vpop.trf.xlu0 }
 0x192   : > { %981 = vst.msk [vmem:[%s202_s20] sm:$0xff] %vm980_vm1, %v964_v34 }
 0x193 PF: > { %s13_s14 = sadd.s32 1, %s1251_s14   ;;  %s1570_s12 = smov %s1247_s13 }
 0x194   : > { %p10_p5 = scmp.ge.s32.totalorder %s13_s14, 4   ;;  %s1571_s13 = smov %s1573_s15 }
 0x196   :  { %12 = sbr.rel (!%p10_p5) target bundleno = 2 (0x2), region = 72 }

</bundles_post_ra>
